<compile_context>
chip_gen: v6e
topology: v6e:2x2x1
jax: 0.10.0
libtpu: 0.0.40
codegen_flags: <defaults>
</compile_context>

<pallas_src>
import functools

import jax
import jax.numpy as jnp
from jax.experimental import pallas as pl
from jax.experimental.pallas import tpu as pltpu

_MIB = 1024 * 1024


def _round_up(x: int, m: int) -> int:
    return ((x + m - 1) // m) * m


def _round_down(x: int, m: int) -> int:
    return (x // m) * m


def _l2mae_kernel(x_ref, t_ref, o_ref, acc_ref, *, n8, total_blocks, bpc):
    """One grid step over a sublane+lane dense (D*8, TN8) tile.

    x_ref / t_ref : (D*8, TN8) tiles, native input dtype.
                    sublane k*8+g, lane j  <->  original row g*N8 + (block-col j),
                    component k.
    o_ref         : (1, 8, 128) per-chunk partial-sum tile (scalar broadcast).
    acc_ref       : (8, TN8) float32 lane/sublane-wise accumulator scratch.
    """
    c = pl.program_id(0)           # parallel chunk (megacore split on 2-TC chips)
    j = pl.program_id(1)           # sequential block within the chunk
    blk = c * bpc + j              # unclamped linear block index

    @pl.when(j == 0)
    def _init():
        acc_ref[...] = jnp.zeros_like(acc_ref)

    d8, tn8 = x_ref.shape
    d = d8 // 8

    if d <= 32:
        # Typical case (e.g. 3-D force vectors): unrolled, sublane-aligned
        # (8, TN8) slices -> D subs + D muls + (D-1) adds on full vregs.
        s = None
        for k in range(d):
            dk = (x_ref[k * 8:(k + 1) * 8, :].astype(jnp.float32)
                  - t_ref[k * 8:(k + 1) * 8, :].astype(jnp.float32))
            s = dk * dk if s is None else s + dk * dk
    else:
        diff = x_ref[...].astype(jnp.float32) - t_ref[...].astype(jnp.float32)
        s = jnp.sum((diff * diff).reshape(d, 8, tn8), axis=0)

    dist = jnp.sqrt(s)             # (8, TN8), EUP

    # Hot path: interior blocks need no masking at all.
    @pl.when(blk < total_blocks - 1)
    def _interior():
        acc_ref[...] += dist

    # Tail path: last block of the array (partial columns) and any clamped
    # duplicate blocks from an uneven chunk split (fully masked out).
    @pl.when(blk >= total_blocks - 1)
    def _tail():
        lane = jax.lax.broadcasted_iota(jnp.int32, dist.shape, 1)
        valid = blk * tn8 + lane < n8
        acc_ref[...] += jnp.where(valid, dist, 0.0)

    @pl.when(j == bpc - 1)
    def _flush():
        # Single cross-lane/sublane reduce per chunk; broadcast the scalar
        # into the (1, 8, 128) output tile (wrapper reads [:, 0, 0]).
        o_ref[...] = jnp.full(o_ref.shape, jnp.sum(acc_ref[...]), dtype=o_ref.dtype)


def l2mae_loss(inp: jax.Array, tgt: jax.Array, reduction: str = "mean",
               block_cols: int | None = None) -> jax.Array:
    assert reduction in ("mean", "sum")
    assert inp.shape == tgt.shape
    d = inp.shape[-1]

    x = inp.reshape(-1, d)
    t = tgt.reshape(-1, d)
    n = x.shape[0]

    # Lane+sublane dense layout: (N, D) -> (D, N) -> zero-pad N to mult of 8
    # -> (D*8, N/8).  Zero-padded rows contribute exactly sqrt(0) = 0.
    # No dtype upcast here: the kernel upcasts to f32 internally, so bf16
    # inputs stream at half the HBM bytes.
    # TODO(synk): ideally the producer already emits this transposed layout;
    # the swapaxes below is one extra XLA relayout pass over each input
    # (allow_input_fusion below lets XLA fuse it into the kernel's operand).
    n_pad = _round_up(max(n, 8), 8)
    xt = jnp.swapaxes(x, 0, 1)                     # (D, N)
    tt = jnp.swapaxes(t, 0, 1)
    if n_pad != n:
        pad = ((0, 0), (0, n_pad - n))
        xt = jnp.pad(xt, pad)
        tt = jnp.pad(tt, pad)
    n8 = n_pad // 8
    x2 = xt.reshape(d * 8, n8)                     # sublane = component*8 + group
    t2 = tt.reshape(d * 8, n8)

    # ---- Hardware-aware sizing -------------------------------------------
    try:
        info = pltpu.get_tpu_info()
    except Exception:
        info = None

    vmem_cap = None
    if info is not None:
        for name in ("vmem_capacity_bytes", "vmem_bytes", "vmem_size_bytes"):
            v = getattr(info, name, None)
            if isinstance(v, int) and v > 0:
                vmem_cap = v
                break
    if vmem_cap is None:
        vmem_cap = 64 * _MIB                       # conservative (v7x per-TC VMEM)

    itemsize = jnp.dtype(x2.dtype).itemsize
    if block_cols is None:
        # ~8 MiB per input block buffer on 128-MiB-VMEM chips (v5e/v6e),
        # ~4 MiB on 64-MiB v7x.  Pipeline double-buffers 2 inputs -> 4 buffers.
        per_buf = 8 * _MIB if vmem_cap > 96 * _MIB else 4 * _MIB
        block_cols = _round_down(per_buf // (d * 8 * itemsize), 128)
        block_cols = max(128, min(block_cols, 1 << 17))
    block_cols = max(128, min(block_cols, _round_up(n8, 128)))
    block_cols = max(128, _round_down(block_cols, 128))

    total_blocks = pl.cdiv(n8, block_cols)

    # 2-way chunk split only if the chip may have 2 TensorCores (v7x);
    # harmless (one masked duplicate block) if the query is inconclusive.
    num_tc = None
    if info is not None:
        for name in ("num_cores", "core_count", "tensorcore_count", "num_tensorcores"):
            v = getattr(info, name, None)
            if isinstance(v, int) and v > 0:
                num_tc = v
                break
    if num_tc is None:
        num_tc = 2
    num_chunks = max(1, min(num_tc, 2, total_blocks))
    bpc = pl.cdiv(total_blocks, num_chunks)        # blocks per chunk

    vmem_limit = max(32 * _MIB, int(min(0.75 * vmem_cap, 112 * _MIB)))

    def in_map(c, j):
        # Clamp so the (rare) extra steps of an uneven split re-read a valid
        # block; their contribution is fully masked inside the kernel.
        return (0, jnp.minimum(c * bpc + j, total_blocks - 1))

    kernel = functools.partial(_l2mae_kernel, n8=n8,
                               total_blocks=total_blocks, bpc=bpc)

    partials = pl.pallas_call(
        kernel,
        out_shape=jax.ShapeDtypeStruct((num_chunks, 8, 128), jnp.float32),
        grid_spec=pltpu.PrefetchScalarGridSpec(
            num_scalar_prefetch=0,
            grid=(num_chunks, bpc),
            in_specs=[
                pl.BlockSpec((d * 8, block_cols), in_map),
                pl.BlockSpec((d * 8, block_cols), in_map),
            ],
            out_specs=pl.BlockSpec((1, 8, 128), lambda c, j: (c, 0, 0)),
            scratch_shapes=[pltpu.VMEM((8, block_cols), jnp.float32)],
        ),
        compiler_params=pltpu.CompilerParams(
            dimension_semantics=("parallel", "arbitrary"),
            vmem_limit_bytes=vmem_limit,
            allow_input_fusion=[True, True],
        ),
    )(x2, t2)

    total = jnp.sum(partials[:, 0, 0])
    if reduction == "mean":
        return total / jnp.float32(n)
    return total


if __name__ == "__main__":
    key = jax.random.PRNGKey(0)
    k1, k2, k3, k4 = jax.random.split(key, 4)

    # Case 1: per-atom 3-D vectors with a leading batch dim (flatten path,
    # zero-pad path, single-block path).
    inp = jax.random.normal(k1, (2, 50, 3), dtype=jnp.float32)
    tgt = jax.random.normal(k2, (2, 50, 3), dtype=jnp.float32)
    ref = jnp.linalg.norm(inp - tgt, axis=-1)

    loss_mean = jax.block_until_ready(l2mae_loss(inp, tgt, reduction="mean"))
    loss_sum = jax.block_until_ready(l2mae_loss(inp, tgt, reduction="sum"))
    assert jnp.allclose(loss_mean, jnp.mean(ref), rtol=1e-5, atol=1e-5)
    assert jnp.allclose(loss_sum, jnp.sum(ref), rtol=1e-5, atol=1e-4)

    # Case 2: larger row count with a small forced block so multi-block
    # accumulation, the 2-chunk split (with a clamped duplicate block) and
    # the masked tail block are all exercised.
    inp2 = jax.random.normal(k3, (4997, 3), dtype=jnp.float32)
    tgt2 = jax.random.normal(k4, (4997, 3), dtype=jnp.float32)
    ref2 = jnp.mean(jnp.linalg.norm(inp2 - tgt2, axis=-1))
    loss2 = jax.block_until_ready(
        l2mae_loss(inp2, tgt2, reduction="mean", block_cols=128))
    assert jnp.allclose(loss2, ref2, rtol=1e-4, atol=1e-4)

    # Case 3: bf16 inputs (in-kernel f32 upcast path).
    inp3 = inp2.astype(jnp.bfloat16)
    tgt3 = tgt2.astype(jnp.bfloat16)
    ref3 = jnp.mean(jnp.linalg.norm(
        inp3.astype(jnp.float32) - tgt3.astype(jnp.float32), axis=-1))
    loss3 = jax.block_until_ready(l2mae_loss(inp3, tgt3, reduction="mean"))
    assert jnp.allclose(loss3, ref3, rtol=1e-4, atol=1e-4)

    print("KERNEL_OK")
</pallas_src>

<mosaic_0001>
module attributes {stable_mosaic.version = 11 : i64} {
  func.func @_l2mae_kernel(%arg0: i32, %arg1: i32, %arg2: memref<24x128xf32, #tpu.memory_space<vmem>>, %arg3: memref<24x128xf32, #tpu.memory_space<vmem>>, %arg4: memref<1x8x128xf32, #tpu.memory_space<vmem>>, %arg5: memref<8x128xf32, #tpu.memory_space<vmem>>) attributes {dimension_semantics = [#tpu.dimension_semantics<parallel>, #tpu.dimension_semantics<arbitrary>], iteration_bounds = array<i64: 1, 1>, scalar_prefetch = 0 : i64, scratch_operands = 1 : i64, tpu.core_type = #tpu.core_type<tc>, window_params = [{transform_indices = @transform_0, window_bounds = array<i64: 24, 128>}, {transform_indices = @transform_1, window_bounds = array<i64: 24, 128>}, {transform_indices = @transform_2, window_bounds = array<i64: 1, 8, 128>}]} {
    %c1_i32 = arith.constant 1 : i32
    %0 = arith.muli %arg0, %c1_i32 : i32
    %1 = arith.addi %0, %arg1 : i32
    %c0_i32 = arith.constant 0 : i32
    %2 = arith.cmpi eq, %arg1, %c0_i32 : i32
    %3 = arith.extui %2 : i1 to i32
    %c0_i32_0 = arith.constant 0 : i32
    %4 = arith.cmpi ne, %3, %c0_i32_0 : i32
    scf.if %4 {
      %cst = arith.constant 0.000000e+00 : f32
      %29 = vector.broadcast %cst : f32 to vector<8x128xf32>
      %c0_16 = arith.constant 0 : index
      %c0_17 = arith.constant 0 : index
      %30 = vector.load %arg5[%c0_16, %c0_17] : memref<8x128xf32, #tpu.memory_space<vmem>>, vector<8x128xf32>
      tpu.vector_store %arg5[%c0_16, %c0_17], %29 {strides = array<i32>} : memref<8x128xf32, #tpu.memory_space<vmem>>, vector<8x128xf32>,
    } else {
    }
    %c0 = arith.constant 0 : index
    %c0_1 = arith.constant 0 : index
    %5 = vector.load %arg2[%c0, %c0_1] : memref<24x128xf32, #tpu.memory_space<vmem>>, vector<8x128xf32>
    %c0_2 = arith.constant 0 : index
    %c0_3 = arith.constant 0 : index
    %6 = vector.load %arg3[%c0_2, %c0_3] : memref<24x128xf32, #tpu.memory_space<vmem>>, vector<8x128xf32>
    %7 = arith.subf %5, %6 : vector<8x128xf32>
    %8 = arith.mulf %7, %7 : vector<8x128xf32>
    %c8 = arith.constant 8 : index
    %c0_4 = arith.constant 0 : index
    %9 = vector.load %arg2[%c8, %c0_4] : memref<24x128xf32, #tpu.memory_space<vmem>>, vector<8x128xf32>
    %c8_5 = arith.constant 8 : index
    %c0_6 = arith.constant 0 : index
    %10 = vector.load %arg3[%c8_5, %c0_6] : memref<24x128xf32, #tpu.memory_space<vmem>>, vector<8x128xf32>
    %11 = arith.subf %9, %10 : vector<8x128xf32>
    %12 = arith.mulf %11, %11 : vector<8x128xf32>
    %13 = arith.addf %8, %12 : vector<8x128xf32>
    %c16 = arith.constant 16 : index
    %c0_7 = arith.constant 0 : index
    %14 = vector.load %arg2[%c16, %c0_7] : memref<24x128xf32, #tpu.memory_space<vmem>>, vector<8x128xf32>
    %c16_8 = arith.constant 16 : index
    %c0_9 = arith.constant 0 : index
    %15 = vector.load %arg3[%c16_8, %c0_9] : memref<24x128xf32, #tpu.memory_space<vmem>>, vector<8x128xf32>
    %16 = arith.subf %14, %15 : vector<8x128xf32>
    %17 = arith.mulf %16, %16 : vector<8x128xf32>
    %18 = arith.addf %13, %17 : vector<8x128xf32>
    %19 = math.sqrt %18 : vector<8x128xf32>
    %c0_i32_10 = arith.constant 0 : i32
    %20 = arith.cmpi slt, %1, %c0_i32_10 : i32
    %21 = arith.extui %20 : i1 to i32
    %c0_i32_11 = arith.constant 0 : i32
    %22 = arith.cmpi ne, %21, %c0_i32_11 : i32
    scf.if %22 {
      %c0_16 = arith.constant 0 : index
      %c0_17 = arith.constant 0 : index
      %29 = vector.load %arg5[%c0_16, %c0_17] : memref<8x128xf32, #tpu.memory_space<vmem>>, vector<8x128xf32>
      %30 = arith.addf %29, %19 : vector<8x128xf32>
      %c0_18 = arith.constant 0 : index
      %c0_19 = arith.constant 0 : index
      %31 = vector.load %arg5[%c0_18, %c0_19] : memref<8x128xf32, #tpu.memory_space<vmem>>, vector<8x128xf32>
      tpu.vector_store %arg5[%c0_18, %c0_19], %30 {strides = array<i32>} : memref<8x128xf32, #tpu.memory_space<vmem>>, vector<8x128xf32>,
    } else {
    }
    %c0_i32_12 = arith.constant 0 : i32
    %23 = arith.cmpi sge, %1, %c0_i32_12 : i32
    %24 = arith.extui %23 : i1 to i32
    %c0_i32_13 = arith.constant 0 : i32
    %25 = arith.cmpi ne, %24, %c0_i32_13 : i32
    scf.if %25 {
      %29 = tpu.iota {dimensions = array<i32: 1>} : vector<8x128xi32>
      %c128_i32 = arith.constant 128 : i32
      %30 = arith.muli %1, %c128_i32 : i32
      %31 = vector.broadcast %30 : i32 to vector<8x128xi32>
      %32 = arith.addi %31, %29 : vector<8x128xi32>
      %c13_i32 = arith.constant 13 : i32
      %33 = vector.broadcast %c13_i32 : i32 to vector<8x128xi32>
      %34 = arith.cmpi slt, %32, %33 : vector<8x128xi32>
      %c0_16 = arith.constant 0 : index
      %c0_17 = arith.constant 0 : index
      %35 = vector.load %arg5[%c0_16, %c0_17] : memref<8x128xf32, #tpu.memory_space<vmem>>, vector<8x128xf32>
      %cst = arith.constant 0.000000e+00 : f32
      %36 = vector.broadcast %cst : f32 to vector<8x128xf32>
      %37 = arith.select %34, %19, %36 : vector<8x128xi1>, vector<8x128xf32>
      %38 = arith.addf %35, %37 : vector<8x128xf32>
      %c0_18 = arith.constant 0 : index
      %c0_19 = arith.constant 0 : index
      %39 = vector.load %arg5[%c0_18, %c0_19] : memref<8x128xf32, #tpu.memory_space<vmem>>, vector<8x128xf32>
      tpu.vector_store %arg5[%c0_18, %c0_19], %38 {strides = array<i32>} : memref<8x128xf32, #tpu.memory_space<vmem>>, vector<8x128xf32>,
    } else {
    }
    %c0_i32_14 = arith.constant 0 : i32
    %26 = arith.cmpi eq, %arg1, %c0_i32_14 : i32
    %27 = arith.extui %26 : i1 to i32
    %c0_i32_15 = arith.constant 0 : i32
    %28 = arith.cmpi ne, %27, %c0_i32_15 : i32
    scf.if %28 {
      %c0_16 = arith.constant 0 : index
      %c0_17 = arith.constant 0 : index
      %29 = vector.load %arg5[%c0_16, %c0_17] : memref<8x128xf32, #tpu.memory_space<vmem>>, vector<8x128xf32>
      %30 = vector.shape_cast %29 : vector<8x128xf32> to vector<1x8x128xf32>
      %cst = arith.constant dense<0.000000e+00> : vector<1xf32>
      %31 = vector.multi_reduction <add>, %30, %cst [1, 2] : vector<1x8x128xf32> to vector<1xf32>
      %32 = vector.shape_cast %31 : vector<1xf32> to vector<1x1x1xf32>
      %33 = vector.extract %32[0, 0, 0] : f32 from vector<1x1x1xf32>
      %34 = vector.broadcast %33 : f32 to vector<1x8x128xf32>
      %c0_18 = arith.constant 0 : index
      %c0_19 = arith.constant 0 : index
      %c0_20 = arith.constant 0 : index
      %35 = vector.load %arg4[%c0_18, %c0_19, %c0_20] : memref<1x8x128xf32, #tpu.memory_space<vmem>>, vector<1x8x128xf32>
      tpu.vector_store %arg4[%c0_18, %c0_19, %c0_20], %34 {strides = array<i32>} : memref<1x8x128xf32, #tpu.memory_space<vmem>>, vector<1x8x128xf32>,
    } else {
    }
    return
  }
  func.func @transform_0(%arg0: i32, %arg1: i32) -> (i32, i32) {
    %c1_i32 = arith.constant 1 : i32
    %0 = arith.muli %arg0, %c1_i32 : i32
    %1 = arith.addi %0, %arg1 : i32
    %c0_i32 = arith.constant 0 : i32
    %2 = arith.minsi %1, %c0_i32 : i32
    %c0_i32_0 = arith.constant 0 : i32
    %c0_i32_1 = arith.constant 0 : i32
    return %c0_i32_0, %2 : i32, i32
  }
  func.func @transform_1(%arg0: i32, %arg1: i32) -> (i32, i32) {
    %c1_i32 = arith.constant 1 : i32
    %0 = arith.muli %arg0, %c1_i32 : i32
    %1 = arith.addi %0, %arg1 : i32
    %c0_i32 = arith.constant 0 : i32
    %2 = arith.minsi %1, %c0_i32 : i32
    %c0_i32_0 = arith.constant 0 : i32
    %c0_i32_1 = arith.constant 0 : i32
    return %c0_i32_0, %2 : i32, i32
  }
  func.func @transform_2(%arg0: i32, %arg1: i32) -> (i32, i32, i32) {
    %c0_i32 = arith.constant 0 : i32
    %c0_i32_0 = arith.constant 0 : i32
    %c0_i32_1 = arith.constant 0 : i32
    return %arg0, %c0_i32, %c0_i32_0 : i32, i32, i32
  }
}

</mosaic_0001>

<bundles_post_ra>
// kernel: tpu_custom_call.1
= control target key start
LH: loop header
LB: loop body
LE: loop exit
PB: predicated region body
PF: predicated region fallthrough
CT: control target
= control target key end

     0   :  { %s219_s0 = inlined_call_operand.vmem [shape: f32[24,13], index: 0, kind: input, shape index: {}]   ;;  %s220_s1 = inlined_call_operand.vmem [shape: f32[24,13], index: 1, kind: input, shape index: {}]   ;;  %s221_s2 = inlined_call_operand.hbm [shape: f32[1,8,128], index: 2, kind: output, shape index: {}]  }
   0x1   :  { %v72_v0 = vld [vmem:[%s219_s0] sm:$0xff]  ;;  %v76_v2 = vld [vmem:[%s219_s0 + $0x8] sm:$0xff]  ;;  %v81_v5 = vld [vmem:[%s219_s0 + $0x10] sm:$0xff] }
   0x2   :  { %v73_v1 = vld [vmem:[%s220_s1] sm:$0xff]  ;;  %v77_v4 = vld [vmem:[%s220_s1 + $0x8] sm:$0xff]  ;;  %v82_v6 = vld [vmem:[%s220_s1 + $0x10] sm:$0xff] }
   0x3   :  { %v74_v3 = vsub.f32 %v72_v0, %v73_v1  ;;  %v78_v7 = vsub.f32 %v76_v2, %v77_v4  ;;  %v83_v8 = vsub.f32 %v81_v5, %v82_v6 }
   0x4   :  { %7 = vsyncpa [#allocation4], 0  ;;  %v104_v14 = vlaneseq  ;;  %s182_s0 = smov [#allocation3]  }
   0x5   :  { %v75_v9 = vmul.f32 %v74_v3, %v74_v3  ;;  %v79_v10 = vmul.f32 %v78_v7, %v78_v7  ;;  %v84_v11 = vmul.f32 %v83_v8, %v83_v8  ;;  %s135_s1 = sshll.u32 %s182_s0, 4  ;;  %s136_s1 = int_to_ptr.vmem [resolvable:$true] %s135_s1 }
   0x6   :  { %v105_v15 = vand.u32 127, %v104_v14  ;;  %s160_s22 = scalar_lea.vmem %s136_s1, 128  ;;  %p165_p1 = scmp.lt.s32.totalorder %s136_s1, %s136_s1 }
   0x7   :  { %v80_v12 = vadd.f32 %v79_v10, %v75_v9  ;;  %p161_p0 = scmp.ne.s32.totalorder %s136_s1, %s160_s22  ;;  %p166_p2 = scmp.lt.s32.totalorder %s160_s22, %s160_s22 }
   0x8   :  { %vm109_vm2 = vcmp.lt.s32.totalorder %v105_v15, 13 }
   0x9   :  { %v85_v13 = vadd.f32 %v84_v11, %v80_v12  ;;  %p167_p3 = por %p166_p2, %p165_p1 }
   0xb   :  { %158 = vrsqrt.f32 %v85_v13  ;;  %vm88_vm0 = vcmp.eq.f32.partialorder %v85_v13, inf  ;;  %v91_v17 = vand.u32 2147483648, %v85_v13  ;;  %vm90_vm1 = vcmp.eq.f32.partialorder %v85_v13, 0.0  ;;  %p168_p4 = pnand %p167_p3, %p161_p0 }
  0x18   :  { %v159_v16 = vpop.eup %158 }
  0x19   :  { %v87_v18 = vmul.f32 %v159_v16, %v85_v13 }
  0x1b   :  { %v89_v19 = vsel %vm88_vm0, %v85_v13, %v87_v18 }
  0x1c   :  { %v92_v20 = vsel %vm90_vm1, %v91_v17, %v89_v19 }
  0x1d   :  { %v111_v21 = vsel %vm109_vm2, %v92_v20, 0.0 }
  0x1e   :  { %118 = vadd.xlane.f32.xlu0 %v111_v21 }
  0xa7   :  { %v119_v22 = vpop.xlane.xlu0 %118 }
  0xa8   :  { %v120_v23 = vrot.slane %v119_v22, 4 }
  0xaa   :  { %v121_v24 = vadd.f32 %v120_v23, %v119_v22 }
  0xac   :  { %v122_v25 = vrot.slane %v121_v24, 2 }
  0xae   :  { %v123_v26 = vadd.f32 %v122_v25, %v121_v24 }
  0xb0   :  { %v124_v27 = vrot.slane %v123_v26, 1 }
  0xb2   :  { %v125_v28 = vadd.f32 %v124_v27, %v123_v26 }
  0xb4   :  { %155 = vpush %v125_v28 }
  0xe5   :  { %s156_s21 = spop %155 }
  0xe6   :  { %v127_v29 = vstv %s156_s21 }
  0xe7   :  { %128 = vst [vmem:[#allocation3] sm:$0xff] %v127_v29 }
  0xe8   :  { %171 = shalt.err (!%p168_p4)
}
  0xe9   :  { %138 = dma.vmem_to_hbm [thread:$0]  %s136_s1, 128, %s221_s2, [#allocation4]  }
  0xea   :  { %180 = dma.done.wait [#allocation4], 128  }
  0xeb   :  { %181 = vsyncadd [#allocation4], 4294967168 }
  0xec   :  { %142 = vsyncpa [#allocation4], 1 }

</bundles_post_ra>
